<compile_context>
chip_gen: v7x
topology: tpu7x:2x2x1
jax: 0.10.0
libtpu: 0.0.40
codegen_flags: <defaults>
</compile_context>

<pallas_src>
import functools

import jax
import jax.numpy as jnp
from jax.experimental import pallas as pl
from jax.experimental.pallas import tpu as pltpu

# ---- YOLOv3 constants (deterministic, in-script) -------------------------
ANCHORS = [(10, 13), (16, 30), (33, 23),
           (30, 61), (62, 45), (59, 119),
           (116, 90), (156, 198), (373, 326)]
NUM_ANCHORS_PER_SCALE = 3
NUM_CLASSES = 80
NUM_ATTRIB = 5 + NUM_CLASSES  # x, y, w, h, conf, classes


def _anchors_for_scale(scale):
    idx = {'s': (0, 1, 2), 'm': (3, 4, 5), 'l': (6, 7, 8)}[scale]
    # Python float constants -> baked straight into the kernel.
    return tuple((float(ANCHORS[i][0]), float(ANCHORS[i][1])) for i in idx)


def _pick_block_rows(num_ba, num_anchors, bytes_per_slice, max_bytes=4 << 20):
    """How many (batch, anchor) slices to process per grid step.

    Must be a multiple of num_anchors (so the anchor pattern inside every block
    is the same, letting anchors be compile-time constants) and divide num_ba.
    Prefer the largest block <= ~4 MiB that still leaves >= 2 grid steps so the
    two v7x TensorCores both get work."""
    nb = num_ba // num_anchors
    cands = [num_anchors * d for d in range(1, nb + 1) if nb % d == 0]
    fits = [c for c in cands if c * bytes_per_slice <= max_bytes]
    if not fits:
        return num_anchors
    multi = [c for c in fits if num_ba // c >= 2]
    return max(multi) if multi else max(fits)


# ---- Pallas kernel --------------------------------------------------------
def yolo_decode_kernel(goff_ref, pred_ref, out_ref, *, stride, anchors, blk):
    """Decode `blk` (batch, anchor) slices.

    goff_ref : VMEM (2, S)        row 0 = grid_x, row 1 = grid_y (S = G*G)
    pred_ref : VMEM (blk, NA, S)  raw network outputs, natural NCHW-derived layout
    out_ref  : VMEM (blk, S, NA)  decoded, attribute-last (final output layout)
    """
    goff = goff_ref[...].astype(jnp.float32)                 # (2, S)
    num_anchors = len(anchors)
    for i in range(blk):                                     # static unroll (blk small)
        aw, ah = anchors[i % num_anchors]                    # Python float constants
        p = pred_ref[i].astype(jnp.float32)                  # (NA, S), spatial on lanes
        sig = jax.nn.sigmoid(p)                              # EUP, lane-dense
        xy = (sig[0:2, :] + goff) * stride                   # x_center, y_center rows
        ewh = jnp.exp(p[2:4, :])                             # exp only on w/h rows
        w = ewh[0:1, :] * aw
        h = ewh[1:2, :] * ah
        dec = jnp.concatenate([xy, w, h, sig[4:, :]], axis=0)  # (NA, S)
        # Attribute-last reordering absorbed in-kernel (XLU slot is idle here).
        out_ref[i] = dec.T.astype(out_ref.dtype)             # (S, NA)


# ---- Wrapper (YoloLayer.forward equivalent) -------------------------------
def yolo_layer(x, scale, stride, training=False):
    """x: (B, NUM_ANCHORS_PER_SCALE * NUM_ATTRIB, G, G), NCHW."""
    b = x.shape[0]
    g = x.shape[2]
    a = NUM_ANCHORS_PER_SCALE
    na = NUM_ATTRIB
    s = g * g

    if training:
        # Raw permuted view only (no decode) — pure layout op, plain JAX.
        return jnp.transpose(x.reshape(b, a, na, g, g),
                             (0, 1, 3, 4, 2)).reshape(b, -1, na)

    anchors = _anchors_for_scale(scale)

    # Free reshape (same memory layout): NCHW -> (B*A, NA, G*G). No transpose.
    pred = x.reshape(b * a, na, s)

    # Tiny grid-offset table (x = s % G, y = s // G), shared by every block.
    sidx = jnp.arange(s, dtype=jnp.int32)
    goff = jnp.stack([(sidx % g).astype(jnp.float32),
                      (sidx // g).astype(jnp.float32)], axis=0)       # (2, S)

    ba = b * a
    bytes_per_slice = na * s * jnp.dtype(x.dtype).itemsize
    blk = _pick_block_rows(ba, a, bytes_per_slice)
    grid = (ba // blk,)

    kernel = functools.partial(yolo_decode_kernel, stride=float(stride),
                               anchors=anchors, blk=blk)
    out = pl.pallas_call(
        kernel,
        out_shape=jax.ShapeDtypeStruct((ba, s, na), x.dtype),
        grid=grid,
        in_specs=[
            pl.BlockSpec((2, s), lambda i: (0, 0)),           # grid offsets (shared)
            pl.BlockSpec((blk, na, s), lambda i: (i, 0, 0)),  # raw preds, natural layout
        ],
        out_specs=pl.BlockSpec((blk, s, na), lambda i: (i, 0, 0)),
        compiler_params=pltpu.CompilerParams(
            dimension_semantics=("parallel",)),
    )(goff, pred)

    # (B*A, G*G, NA) -> (B, A*G*G, NA): free reshape, matches torch view(B,-1,NA).
    return out.reshape(b, a * s, na)


# ---- Pure-JAX reference for validation ------------------------------------
def yolo_layer_ref(x, scale, stride):
    b = x.shape[0]
    g = x.shape[2]
    a = NUM_ANCHORS_PER_SCALE
    na = NUM_ATTRIB
    anchors = jnp.asarray(_anchors_for_scale(scale), dtype=jnp.float32)  # (3, 2)
    pred = jnp.transpose(x.reshape(b, a, na, g, g), (0, 1, 3, 4, 2))
    gx = jnp.arange(g, dtype=jnp.float32).reshape(1, 1, 1, g)
    gy = jnp.arange(g, dtype=jnp.float32).reshape(1, 1, g, 1)
    aw = anchors[:, 0].reshape(1, a, 1, 1)
    ah = anchors[:, 1].reshape(1, a, 1, 1)
    xc = (jax.nn.sigmoid(pred[..., 0]) + gx) * stride
    yc = (jax.nn.sigmoid(pred[..., 1]) + gy) * stride
    w = jnp.exp(pred[..., 2]) * aw
    h = jnp.exp(pred[..., 3]) * ah
    bbox = jnp.stack([xc, yc, w, h], axis=4).reshape(b, -1, 4)
    conf = jax.nn.sigmoid(pred[..., 4]).reshape(b, -1, 1)
    cls = jax.nn.sigmoid(pred[..., 5:]).reshape(b, -1, NUM_CLASSES)
    return jnp.concatenate([bbox, conf, cls], axis=-1)


if __name__ == "__main__":
    key = jax.random.PRNGKey(0)
    B, G = 2, 8
    scale, stride = 'l', 32
    x = jax.random.normal(
        key, (B, NUM_ANCHORS_PER_SCALE * NUM_ATTRIB, G, G), dtype=jnp.float32)

    out = yolo_layer(x, scale, stride, training=False)
    out = jax.block_until_ready(out)

    ref = yolo_layer_ref(x, scale, stride)
    assert out.shape == (B, NUM_ANCHORS_PER_SCALE * G * G, NUM_ATTRIB)
    assert jnp.allclose(out, ref, rtol=1e-5, atol=1e-5)
    print("KERNEL_OK")
</pallas_src>

<mosaic_0001>
module attributes {stable_mosaic.version = 11 : i64} {
  func.func @yolo_decode_kernel(%arg0: i32, %arg1: memref<2x64xf32, #tpu.memory_space<vmem>>, %arg2: memref<3x85x64xf32, #tpu.memory_space<vmem>>, %arg3: memref<3x64x85xf32, #tpu.memory_space<vmem>>) attributes {dimension_semantics = [#tpu.dimension_semantics<parallel>], iteration_bounds = array<i64: 2>, scalar_prefetch = 0 : i64, scratch_operands = 0 : i64, tpu.core_type = #tpu.core_type<tc>, window_params = [{pipeline_mode = #tpu.pipeline_mode<synchronous>, transform_indices = @transform_0, window_bounds = array<i64: 2, 64>}, {transform_indices = @transform_1, window_bounds = array<i64: 3, 85, 64>}, {transform_indices = @transform_2, window_bounds = array<i64: 3, 64, 85>}]} {
    %c0 = arith.constant 0 : index
    %c0_0 = arith.constant 0 : index
    %0 = vector.load %arg1[%c0, %c0_0] : memref<2x64xf32, #tpu.memory_space<vmem>>, vector<2x64xf32>
    %c0_1 = arith.constant 0 : index
    %c0_2 = arith.constant 0 : index
    %c0_3 = arith.constant 0 : index
    %1 = vector.load %arg2[%c0_1, %c0_2, %c0_3] : memref<3x85x64xf32, #tpu.memory_space<vmem>>, vector<1x85x64xf32>
    %2 = vector.shape_cast %1 : vector<1x85x64xf32> to vector<85x64xf32>
    %3 = arith.negf %2 : vector<85x64xf32>
    %4 = math.exp %3 : vector<85x64xf32>
    %cst = arith.constant 1.000000e+00 : f32
    %5 = vector.broadcast %cst : f32 to vector<85x64xf32>
    %6 = arith.addf %5, %4 : vector<85x64xf32>
    %7 = arith.divf %5, %6 : vector<85x64xf32>
    %8 = vector.extract_strided_slice %7 {offsets = [0, 0], sizes = [2, 64], strides = [1, 1]} : vector<85x64xf32> to vector<2x64xf32>
    %9 = arith.addf %8, %0 : vector<2x64xf32>
    %cst_4 = arith.constant 3.200000e+01 : f32
    %10 = vector.broadcast %cst_4 : f32 to vector<2x64xf32>
    %11 = arith.mulf %9, %10 : vector<2x64xf32>
    %12 = vector.extract_strided_slice %2 {offsets = [2, 0], sizes = [2, 64], strides = [1, 1]} : vector<85x64xf32> to vector<2x64xf32>
    %13 = math.exp %12 : vector<2x64xf32>
    %14 = vector.extract_strided_slice %13 {offsets = [0, 0], sizes = [1, 64], strides = [1, 1]} : vector<2x64xf32> to vector<1x64xf32>
    %cst_5 = arith.constant 1.160000e+02 : f32
    %15 = vector.broadcast %cst_5 : f32 to vector<1x64xf32>
    %16 = arith.mulf %14, %15 : vector<1x64xf32>
    %17 = vector.extract_strided_slice %13 {offsets = [1, 0], sizes = [1, 64], strides = [1, 1]} : vector<2x64xf32> to vector<1x64xf32>
    %cst_6 = arith.constant 9.000000e+01 : f32
    %18 = vector.broadcast %cst_6 : f32 to vector<1x64xf32>
    %19 = arith.mulf %17, %18 : vector<1x64xf32>
    %20 = vector.extract_strided_slice %7 {offsets = [4, 0], sizes = [81, 64], strides = [1, 1]} : vector<85x64xf32> to vector<81x64xf32>
    %21 = tpu.concatenate %11, %16, %19, %20 in 0 : vector<2x64xf32>, vector<1x64xf32>, vector<1x64xf32>, vector<81x64xf32> -> vector<85x64xf32>
    %22 = tpu.transpose %21, [1, 0] : vector<85x64xf32> -> vector<64x85xf32>
    %c0_7 = arith.constant 0 : index
    %c0_8 = arith.constant 0 : index
    %c0_9 = arith.constant 0 : index
    %23 = vector.load %arg3[%c0_7, %c0_8, %c0_9] : memref<3x64x85xf32, #tpu.memory_space<vmem>>, vector<1x64x85xf32>
    %24 = vector.shape_cast %23 : vector<1x64x85xf32> to vector<64x85xf32>
    %25 = vector.shape_cast %22 : vector<64x85xf32> to vector<1x64x85xf32>
    tpu.vector_store %arg3[%c0_7, %c0_8, %c0_9], %25 {strides = array<i32>} : memref<3x64x85xf32, #tpu.memory_space<vmem>>, vector<1x64x85xf32>,
    %c1 = arith.constant 1 : index
    %c0_10 = arith.constant 0 : index
    %c0_11 = arith.constant 0 : index
    %26 = vector.load %arg2[%c1, %c0_10, %c0_11] : memref<3x85x64xf32, #tpu.memory_space<vmem>>, vector<1x85x64xf32>
    %27 = vector.shape_cast %26 : vector<1x85x64xf32> to vector<85x64xf32>
    %28 = arith.negf %27 : vector<85x64xf32>
    %29 = math.exp %28 : vector<85x64xf32>
    %cst_12 = arith.constant 1.000000e+00 : f32
    %30 = vector.broadcast %cst_12 : f32 to vector<85x64xf32>
    %31 = arith.addf %30, %29 : vector<85x64xf32>
    %32 = arith.divf %30, %31 : vector<85x64xf32>
    %33 = vector.extract_strided_slice %32 {offsets = [0, 0], sizes = [2, 64], strides = [1, 1]} : vector<85x64xf32> to vector<2x64xf32>
    %34 = arith.addf %33, %0 : vector<2x64xf32>
    %cst_13 = arith.constant 3.200000e+01 : f32
    %35 = vector.broadcast %cst_13 : f32 to vector<2x64xf32>
    %36 = arith.mulf %34, %35 : vector<2x64xf32>
    %37 = vector.extract_strided_slice %27 {offsets = [2, 0], sizes = [2, 64], strides = [1, 1]} : vector<85x64xf32> to vector<2x64xf32>
    %38 = math.exp %37 : vector<2x64xf32>
    %39 = vector.extract_strided_slice %38 {offsets = [0, 0], sizes = [1, 64], strides = [1, 1]} : vector<2x64xf32> to vector<1x64xf32>
    %cst_14 = arith.constant 1.560000e+02 : f32
    %40 = vector.broadcast %cst_14 : f32 to vector<1x64xf32>
    %41 = arith.mulf %39, %40 : vector<1x64xf32>
    %42 = vector.extract_strided_slice %38 {offsets = [1, 0], sizes = [1, 64], strides = [1, 1]} : vector<2x64xf32> to vector<1x64xf32>
    %cst_15 = arith.constant 1.980000e+02 : f32
    %43 = vector.broadcast %cst_15 : f32 to vector<1x64xf32>
    %44 = arith.mulf %42, %43 : vector<1x64xf32>
    %45 = vector.extract_strided_slice %32 {offsets = [4, 0], sizes = [81, 64], strides = [1, 1]} : vector<85x64xf32> to vector<81x64xf32>
    %46 = tpu.concatenate %36, %41, %44, %45 in 0 : vector<2x64xf32>, vector<1x64xf32>, vector<1x64xf32>, vector<81x64xf32> -> vector<85x64xf32>
    %47 = tpu.transpose %46, [1, 0] : vector<85x64xf32> -> vector<64x85xf32>
    %c1_16 = arith.constant 1 : index
    %c0_17 = arith.constant 0 : index
    %c0_18 = arith.constant 0 : index
    %48 = vector.load %arg3[%c1_16, %c0_17, %c0_18] : memref<3x64x85xf32, #tpu.memory_space<vmem>>, vector<1x64x85xf32>
    %49 = vector.shape_cast %48 : vector<1x64x85xf32> to vector<64x85xf32>
    %50 = vector.shape_cast %47 : vector<64x85xf32> to vector<1x64x85xf32>
    tpu.vector_store %arg3[%c1_16, %c0_17, %c0_18], %50 {strides = array<i32>} : memref<3x64x85xf32, #tpu.memory_space<vmem>>, vector<1x64x85xf32>,
    %c2 = arith.constant 2 : index
    %c0_19 = arith.constant 0 : index
    %c0_20 = arith.constant 0 : index
    %51 = vector.load %arg2[%c2, %c0_19, %c0_20] : memref<3x85x64xf32, #tpu.memory_space<vmem>>, vector<1x85x64xf32>
    %52 = vector.shape_cast %51 : vector<1x85x64xf32> to vector<85x64xf32>
    %53 = arith.negf %52 : vector<85x64xf32>
    %54 = math.exp %53 : vector<85x64xf32>
    %cst_21 = arith.constant 1.000000e+00 : f32
    %55 = vector.broadcast %cst_21 : f32 to vector<85x64xf32>
    %56 = arith.addf %55, %54 : vector<85x64xf32>
    %57 = arith.divf %55, %56 : vector<85x64xf32>
    %58 = vector.extract_strided_slice %57 {offsets = [0, 0], sizes = [2, 64], strides = [1, 1]} : vector<85x64xf32> to vector<2x64xf32>
    %59 = arith.addf %58, %0 : vector<2x64xf32>
    %cst_22 = arith.constant 3.200000e+01 : f32
    %60 = vector.broadcast %cst_22 : f32 to vector<2x64xf32>
    %61 = arith.mulf %59, %60 : vector<2x64xf32>
    %62 = vector.extract_strided_slice %52 {offsets = [2, 0], sizes = [2, 64], strides = [1, 1]} : vector<85x64xf32> to vector<2x64xf32>
    %63 = math.exp %62 : vector<2x64xf32>
    %64 = vector.extract_strided_slice %63 {offsets = [0, 0], sizes = [1, 64], strides = [1, 1]} : vector<2x64xf32> to vector<1x64xf32>
    %cst_23 = arith.constant 3.730000e+02 : f32
    %65 = vector.broadcast %cst_23 : f32 to vector<1x64xf32>
    %66 = arith.mulf %64, %65 : vector<1x64xf32>
    %67 = vector.extract_strided_slice %63 {offsets = [1, 0], sizes = [1, 64], strides = [1, 1]} : vector<2x64xf32> to vector<1x64xf32>
    %cst_24 = arith.constant 3.260000e+02 : f32
    %68 = vector.broadcast %cst_24 : f32 to vector<1x64xf32>
    %69 = arith.mulf %67, %68 : vector<1x64xf32>
    %70 = vector.extract_strided_slice %57 {offsets = [4, 0], sizes = [81, 64], strides = [1, 1]} : vector<85x64xf32> to vector<81x64xf32>
    %71 = tpu.concatenate %61, %66, %69, %70 in 0 : vector<2x64xf32>, vector<1x64xf32>, vector<1x64xf32>, vector<81x64xf32> -> vector<85x64xf32>
    %72 = tpu.transpose %71, [1, 0] : vector<85x64xf32> -> vector<64x85xf32>
    %c2_25 = arith.constant 2 : index
    %c0_26 = arith.constant 0 : index
    %c0_27 = arith.constant 0 : index
    %73 = vector.load %arg3[%c2_25, %c0_26, %c0_27] : memref<3x64x85xf32, #tpu.memory_space<vmem>>, vector<1x64x85xf32>
    %74 = vector.shape_cast %73 : vector<1x64x85xf32> to vector<64x85xf32>
    %75 = vector.shape_cast %72 : vector<64x85xf32> to vector<1x64x85xf32>
    tpu.vector_store %arg3[%c2_25, %c0_26, %c0_27], %75 {strides = array<i32>} : memref<3x64x85xf32, #tpu.memory_space<vmem>>, vector<1x64x85xf32>,
    return
  }
  func.func @transform_0(%arg0: i32) -> (i32, i32) {
    %c0_i32 = arith.constant 0 : i32
    %c0_i32_0 = arith.constant 0 : i32
    %c0_i32_1 = arith.constant 0 : i32
    return %c0_i32, %c0_i32_0 : i32, i32
  }
  func.func @transform_1(%arg0: i32) -> (i32, i32, i32) {
    %c0_i32 = arith.constant 0 : i32
    %c0_i32_0 = arith.constant 0 : i32
    %c0_i32_1 = arith.constant 0 : i32
    return %arg0, %c0_i32, %c0_i32_0 : i32, i32, i32
  }
  func.func @transform_2(%arg0: i32) -> (i32, i32, i32) {
    %c0_i32 = arith.constant 0 : i32
    %c0_i32_0 = arith.constant 0 : i32
    %c0_i32_1 = arith.constant 0 : i32
    return %arg0, %c0_i32, %c0_i32_0 : i32, i32, i32
  }
}

</mosaic_0001>

<bundles_post_ra>
// kernel: tpu_custom_call.1
= control target key start
LH: loop header
LB: loop body
LE: loop exit
PB: predicated region body
PF: predicated region fallthrough
CT: control target
= control target key end

     0   :  { %7 = vsyncpa [#allocation3], 0  ;;  %s1172_s0 = inlined_call_operand.vmem [shape: f32[2,64], index: 0, kind: input, shape index: {}]   ;;  %s1173_s1 = inlined_call_operand.vmem [shape: f32[6,85,64], index: 1, kind: input, shape index: {}]   ;;  %s1174_s2 = inlined_call_operand.hbm [shape: f32[6,64,85], index: 2, kind: output, shape index: {}]  }
   0x1   :  { %9 = vsyncpa [#allocation3 + $0x1], 0  ;;  %s959_s9 = smov 0   ;;  %s961_s10 = smov 0  }
   0x2   :  { %s963_s11 = smov 0   ;;  %s965_s12 = smov 0  }
   0x3 LB: > { %s980_s13 = sadd.s32 4294967295, %s939_s12   ;;  %s612_s14 = sadd.s32 4294967294, %s939_s12   ;;  %s939_s12 = sphi %s965_s12, %s1180_s12   ;;  %s935_s11 = sphi %s963_s11, %s1179_s11   ;;  %s931_s10 = sphi %s961_s10, %s1178_s10   ;;  %s927_s9 = sphi %s959_s9, %s1177_s9  }
   0x4   : > { %s984_s15 = sadd.s32 1, %s939_s12   ;;  %s69_s16 = sadd.s32 1, %s935_s11 }
   0x5   : > { %s66_s17 = ssub.s32 %s939_s12, %s984_s15  ;;  %p79_p0 = scmp.ne.s32.totalorder %s935_s11, %s931_s10 }
   0x6   : > { %p67_p1 = scmp.eq.s32.totalorder %s66_s17, 0  ;;  %p80_p2 = scmp.eq.s32.totalorder %s980_s13, 1 }
   0x7   : > { %p85_p3 = scmp.ne.s32.totalorder %s931_s10, %s927_s9  ;;  %p86_p4 = scmp.eq.s32.totalorder %s612_s14, 1 }
   0x8   : > { %s995_s18 = scalar_select %p67_p1, %s935_s11, %s69_s16  }
   0x9   : > { %p997_p5 = por %p80_p2, %p79_p0  ;;  %p1001_p6 = por %p86_p4, %p85_p3 }
   0xa   : > { %p615_p7 = scmp.ge.s32.totalorder %s939_s12, 1  ;;  %p117_p8 = scmp.lt.s32.totalorder %s939_s12, 3 }
   0xc   : > { %p118_p9 = pnand %p615_p7, %p117_p8 }
   0xd   : > { %s140_s21 = smul.u32 (!%p118_p9), 3, %s980_s13  ;;  %v1030_v32 = vld [vmem:[%s1172_s0] sm:$0x3] (!%p118_p9)  ;;  %vm232_vm0 = vcmask (!%p118_p9), 1041408   ;;  %vm234_vm1 = vcmask (!%p118_p9), 1042432   ;;  %vm236_vm2 = vcmask (!%p118_p9), 1043456  }
   0xe   : > { %121 = sbr.rel (%p118_p9) target bundleno = 275 (0x113), region = 28  ;;  %s137_s28 = sand.u32 (!%p118_p9), 1, %s931_s10   ;;  %vm270_vm3 = vcmask (!%p118_p9), 695296  }
   0xf   : > { %p141_p10 = scmp.lt.s32.totalorder (!%p118_p9), %s140_s21, 5  ;;  %s695_s29 = smul.u32 (!%p118_p9), 192, %s137_s28 }
  0x10   : > { %s694_s3 = smul.u32 (!%p118_p9), 3072, %s980_s13  ;;  %s1131_s8 = scalar_lea.sflag (!%p118_p9), [#allocation3], %s137_s28 }
  0x11   : > { %s1070_s30 = scalar_lea.vmem (!%p118_p9), [#allocation2], %s695_s29  ;;  %s941_s14 = smov (!%p118_p9), [#allocation2]  }
  0x12   : > { %s550_s4 = sshll.u32 (!%p118_p9), %s1070_s30, 4  ;;  %s1123_s7 = scalar_lea.hbm (!%p118_p9), %s1174_s2, %s694_s3  ;;  %s1125_s4 = int_to_ptr.vmem [resolvable:$true] %s550_s4 }
  0x13   : > { %s877_s13 = scalar_lea.vmem (!%p118_p9), %s1125_s4, 3072  ;;  %s881_s16 = sshll.u32 (!%p118_p9), %s941_s14, 4  ;;  %s882_s16 = int_to_ptr.vmem [resolvable:$false] %s881_s16 }
  0x14   : > { %p878_p11 = scmp.ne.s32.totalorder (!%p118_p9), %s1125_s4, %s877_s13  ;;  %s883_s17 = scalar_lea.vmem (!%p118_p9), %s882_s16, 6144 }
  0x15   : > { %s1182_s21 = smov (!%p141_p10, %s140_s21), 5  ;;  %p884_p0 = scmp.lt.s32.totalorder %s1125_s4, %s882_s16 }
  0x16   : > { %s696_s22 = smul.u32 88, %s1182_s21  ;;  %p879_p12 = pnand %p878_p11, %p997_p5 }
  0x17   : > { %p885_p1 = scmp.lt.s32.totalorder %s883_s17, %s877_s13 }
  0x18   : > { %s1011_s25 = scalar_lea.vmem %s1173_s1, %s696_s22  ;;  %p880_p13 = pneg %p879_p12 }
  0x19   : > { %v149_v0 = vld [vmem:[%s1011_s25] sm:$0xff]  ;;  %v150_v2 = vld [vmem:[%s1011_s25 + $0x8] sm:$0xff]  ;;  %v151_v4 = vld [vmem:[%s1011_s25 + $0x10] sm:$0xff]  ;;  %p886_p2 = por %p885_p1, %p884_p0 }
  0x1a   : > { %v617_v1 = vmul.f32 -1.442695, %v149_v0  ;;  %v618_v3 = vmul.f32 -1.442695, %v150_v2  ;;  %v152_v5 = vld [vmem:[%s1011_s25 + $0x18] sm:$0xff]  ;;  %v153_v11 = vld [vmem:[%s1011_s25 + $0x20] sm:$0xff] }
  0x1b   : > { %v619_v6 = vmul.f32 -1.442695, %v151_v4  ;;  %v628_v7 = vld [vmem:[%s1011_s25 + $0x58] sm:$0xff]  ;;  %v228_v8 = vmul.f32 1.442695, %v149_v0  ;;  %v154_v14 = vld [vmem:[%s1011_s25 + $0x28] sm:$0xff]  ;;  %p887_p3 = pnand %p886_p2, %p880_p13 }
  0x1c   : > { %739 = vpow2.f32 %v617_v1  ;;  %v620_v9 = vmul.f32 -1.442695, %v152_v5  ;;  %v639_v10 = vmul.f32 -1.442695, %v628_v7  ;;  %v621_v15 = vmul.f32 -1.442695, %v153_v11 }
  0x1d   : > { %741 = vpow2.f32 %v618_v3  ;;  %v155_v16 = vld [vmem:[%s1011_s25 + $0x30] sm:$0xff]  ;;  %v156_v17 = vld [vmem:[%s1011_s25 + $0x38] sm:$0xff]  ;;  %v622_v18 = vmul.f32 -1.442695, %v154_v14  ;;  %v157_v19 = vld [vmem:[%s1011_s25 + $0x40] sm:$0xff] }
  0x1e   : > { %743 = vpow2.f32 %v619_v6  ;;  %v623_v21 = vmul.f32 -1.442695, %v155_v16  ;;  %v624_v22 = vmul.f32 -1.442695, %v156_v17  ;;  %v625_v23 = vmul.f32 -1.442695, %v157_v19 }
  0x1f   : > { %745 = vpow2.f32 %v228_v8  ;;  %v158_v24 = vld [vmem:[%s1011_s25 + $0x48] sm:$0xff]  ;;  %v359_v27 = vmul.f32 1.442695, %v628_v7  ;;  %v1025_v30 = vld [vmem:[%s1011_s25 + $0xb0] sm:$0xff]  ;;  %v629_v33 = vld [vmem:[%s1011_s25 + $0x60] sm:$0xff] }
  0x20   : > { %747 = vpow2.f32 %v620_v9  ;;  %v626_v29 = vmul.f32 -1.442695, %v158_v24  ;;  %v669_v38 = vmul.f32 -1.442695, %v1025_v30  ;;  %v630_v39 = vld [vmem:[%s1011_s25 + $0x68] sm:$0xff]  ;;  %v631_v46 = vld [vmem:[%s1011_s25 + $0x70] sm:$0xff] }
  0x21   : > { %749 = vpow2.f32 %v639_v10  ;;  %v159_v42 = vld [vmem:[%s1011_s25 + $0x50] sm:$0x1f]  ;;  %v640_v43 = vmul.f32 -1.442695, %v629_v33  ;;  %v641_v49 = vmul.f32 -1.442695, %v630_v39 }
  0x22   : > { %v627_v50 = vmul.f32 -1.442695, %v159_v42  ;;  %v632_v51 = vld [vmem:[%s1011_s25 + $0x78] sm:$0xff]  ;;  %v642_v54 = vmul.f32 -1.442695, %v631_v46  ;;  %v633_v61 = vld [vmem:[%s1011_s25 + $0x80] sm:$0xff] }
  0x23   : > { %v643_v60 = vmul.f32 -1.442695, %v632_v51  ;;  %v644_v1 = vmul.f32 -1.442695, %v633_v61  ;;  %v634_v2 = vld [vmem:[%s1011_s25 + $0x88] sm:$0xff] }
  0x24   : > { %v645_v10 = vmul.f32 -1.442695, %v634_v2 }
  0x26   : > { %v740_v12 = vpop.eup %739 }
  0x27   : > { %v193_v13 = vadd.f32 1.0, %v740_v12  ;;  %v742_v20 = vpop.eup %741 }
  0x28   : > { %v194_v25 = vadd.f32 1.0, %v742_v20  ;;  %v744_v26 = vpop.eup %743 }
  0x29   : > { %751 = vrcp.f32 %v193_v13  ;;  %v746_v28 = vpop.eup %745  ;;  %v195_v35 = vadd.f32 1.0, %v744_v26 }
  0x2a   : > { %753 = vpow2.f32 %v621_v15  ;;  %v748_v31 = vpop.eup %747  ;;  %v230_v41 = vmul.f32 116.0, %v746_v28  ;;  %v231_v44 = vmul.f32 90.0, %v746_v28  ;;  %v659_v28 = vld [vmem:[%s1011_s25 + $0xb8] sm:$0xff] }
  0x2b   : > { %755 = vpow2.f32 %v622_v18  ;;  %v750_v34 = vpop.eup %749  ;;  %v196_v45 = vadd.f32 1.0, %v748_v31 }
  0x2c   : > { %757 = vpow2.f32 %v623_v21  ;;  %v324_v37 = vadd.f32 1.0, %v750_v34  ;;  %v487_v34 = vmul.f32 1.442695, %v1025_v30 }
  0x2d   : > { %759 = vpow2.f32 %v624_v22 }
  0x2e   : > { %761 = vpow2.f32 %v625_v23 }
  0x2f   : > { %763 = vrcp.f32 %v194_v25 }
  0x30   : > { %765 = vpow2.f32 %v359_v27 }
  0x31   : > { %767 = vpow2.f32 %v626_v29 }
  0x32   : > { %769 = vrcp.f32 %v324_v37 }
  0x33   : > { %v752_v36 = vpop.eup %751  ;;  %771 = vrcp.f32 %v195_v35  ;;  %v670_v35 = vmul.f32 -1.442695, %v659_v28 }
  0x34   : > { %v226_v40 = vadd.f32 %v752_v36, %v1030_v32  ;;  %v754_v47 = vpop.eup %753  ;;  %773 = vpow2.f32 %v669_v38  ;;  %v660_v38 = vld [vmem:[%s1011_s25 + $0xc0] sm:$0xff] }
  0x35   : > { %v756_v52 = vpop.eup %755  ;;  %775 = vpow2.f32 %v640_v43  ;;  %v197_v57 = vadd.f32 1.0, %v754_v47  ;;  %v636_v43 = vld [vmem:[%s1011_s25 + $0x98] sm:$0xff]  ;;  %v671_v30 = vmul.f32 -1.442695, %v660_v38 }
  0x36   : > { %v227_v48 = vmul.f32 32.0, %v226_v40  ;;  %v758_v55 = vpop.eup %757  ;;  %777 = vrcp.f32 %v196_v45  ;;  %v198_v4 = vadd.f32 1.0, %v756_v52  ;;  %v661_v45 = vld [vmem:[%s1011_s25 + $0xc8] sm:$0xff]  ;;  %v667_v38 = vld [vmem:[%s1011_s25 + $0xf8] sm:$0xff] }
  0x37   : > { %v760_v58 = vpop.eup %759  ;;  %779 = vpow2.f32 %v641_v49  ;;  %v199_v6 = vadd.f32 1.0, %v758_v55  ;;  %v672_v52 = vmul.f32 -1.442695, %v661_v45 }
  0x38   : > { %v233_v53 = vsel %vm232_vm0, %v227_v48, %v230_v41  ;;  %v762_v62 = vpop.eup %761  ;;  %781 = vpow2.f32 %v627_v50  ;;  %v200_v14 = vadd.f32 1.0, %v760_v58  ;;  %v637_v48 = vld [vmem:[%s1011_s25 + $0xa0] sm:$0xff]  ;;  %v647_v50 = vmul.f32 -1.442695, %v636_v43 }
  0x39   : > { %v235_v56 = vsel %vm234_vm1, %v233_v53, %v231_v44  ;;  %v764_v63 = vpop.eup %763  ;;  %783 = vpow2.f32 %v642_v54  ;;  %v201_v19 = vadd.f32 1.0, %v762_v62  ;;  %v638_v53 = vld [vmem:[%s1011_s25 + $0xa8] sm:$0x1f]  ;;  %v648_v55 = vmul.f32 -1.442695, %v637_v48 }
  0x3a   : > { %v237_v59 = vsel %vm236_vm2, %v235_v56, %v752_v36  ;;  %v766_v0 = vpop.eup %765  ;;  %785 = vrcp.f32 %v197_v57  ;;  %v635_v36 = vld [vmem:[%s1011_s25 + $0x90] sm:$0xff] }
  0x3b   : > { %238 = vxpose.xlu0.b32.start [1/11] (short) (narrow) %v237_v59, 64  ;;  %v768_v3 = vpop.eup %767  ;;  %787 = vpow2.f32 %v643_v60  ;;  %v361_v9 = vmul.f32 156.0, %v766_v0  ;;  %v362_v12 = vmul.f32 198.0, %v766_v0  ;;  %v646_v42 = vmul.f32 -1.442695, %v635_v36  ;;  %v662_v57 = vld [vmem:[%s1011_s25 + $0xd0] sm:$0xff] }
  0x3c   : > { %v770_v5 = vpop.eup %769  ;;  %789 = vpow2.f32 %v644_v1  ;;  %v202_v26 = vadd.f32 1.0, %v768_v3  ;;  %v649_v60 = vmul.f32 -1.442695, %v638_v53  ;;  %v663_v0 = vld [vmem:[%s1011_s25 + $0xd8] sm:$0xff] }
  0x3d   : > { %v772_v7 = vpop.eup %771  ;;  %v357_v8 = vadd.f32 %v770_v5, %v1030_v32  ;;  %791 = vrcp.f32 %v198_v4 }
  0x3e   : > { %v774_v11 = vpop.eup %773  ;;  %793 = vrcp.f32 %v199_v6 }
  0x3f   : > { %239 = vxpose.xlu0.b32.cont [2/11] (short) (narrow) %v764_v63, 64  ;;  %v776_v13 = vpop.eup %775  ;;  %v358_v15 = vmul.f32 32.0, %v357_v8  ;;  %795 = vpow2.f32 %v645_v10  ;;  %v452_v23 = vadd.f32 1.0, %v774_v11  ;;  %v673_v63 = vmul.f32 -1.442695, %v662_v57  ;;  %v664_v11 = vld [vmem:[%s1011_s25 + $0xe0] sm:$0xff] }
  0x40   : > { %v778_v16 = vpop.eup %777  ;;  %v325_v17 = vadd.f32 1.0, %v776_v13 }
  0x41   : > { %v780_v18 = vpop.eup %779  ;;  %v363_v20 = vsel %vm232_vm0, %v358_v15, %v361_v9 }
  0x42   : > { %v782_v21 = vpop.eup %781  ;;  %v364_v22 = vsel %vm234_vm1, %v363_v20, %v362_v12  ;;  %797 = vrcp.f32 %v325_v17  ;;  %v326_v24 = vadd.f32 1.0, %v780_v18  ;;  %v665_v20 = vld [vmem:[%s1011_s25 + $0xe8] sm:$0xff] }
  0x43   : > { %240 = vxpose.xlu0.b32.cont [3/11] (short) (narrow) %v772_v7, 64  ;;  %v784_v25 = vpop.eup %783  ;;  %799 = vrcp.f32 %v200_v14  ;;  %v365_v27 = vsel %vm236_vm2, %v364_v22, %v770_v5  ;;  %v203_v37 = vadd.f32 1.0, %v782_v21  ;;  %v674_v5 = vmul.f32 -1.442695, %v663_v0 }
  0x44   : > { %v786_v29 = vpop.eup %785  ;;  %366 = vxpose.xlu1.b32.start [1/11] (short) (narrow) %v365_v27, 64  ;;  %801 = vrcp.f32 %v326_v24  ;;  %v327_v31 = vadd.f32 1.0, %v784_v25  ;;  %v676_v27 = vmul.f32 -1.442695, %v665_v20 }
  0x45   : > { %v788_v33 = vpop.eup %787  ;;  %803 = vrcp.f32 %v201_v19 }
  0x46   : > { %805 = vrcp.f32 %v452_v23  ;;  %v790_v39 = vpop.eup %789  ;;  %v328_v40 = vadd.f32 1.0, %v788_v33 }
  0x47   : > { %241 = vxpose.xlu0.b32.cont [4/11] (short) (narrow) %v778_v16, 64  ;;  %807 = vrcp.f32 %v202_v26  ;;  %v792_v41 = vpop.eup %791  ;;  %v329_v47 = vadd.f32 1.0, %v790_v39  ;;  %v675_v16 = vmul.f32 -1.442695, %v664_v11 }
  0x48   : > { %809 = vrcp.f32 %v327_v31  ;;  %v794_v44 = vpop.eup %793 }
  0x49   : > { %811 = vpow2.f32 %v487_v34  ;;  %v796_v46 = vpop.eup %795 }
  0x4a   : > { %813 = vpow2.f32 %v670_v35  ;;  %v330_v58 = vadd.f32 1.0, %v796_v46 }
  0x4b   : > { %242 = vxpose.xlu0.b32.cont [5/11] (short) (narrow) %v786_v29, 64  ;;  %815 = vrcp.f32 %v203_v37  ;;  %v666_v29 = vld [vmem:[%s1011_s25 + $0xf0] sm:$0xff] }
  0x4c   : > { %v798_v49 = vpop.eup %797  ;;  %817 = vrcp.f32 %v328_v40  ;;  %v677_v35 = vmul.f32 -1.442695, %v666_v29 }
  0x4d   : > { %v800_v51 = vpop.eup %799  ;;  %367 = vxpose.xlu1.b32.cont [2/11] (short) (narrow) %v798_v49, 64  ;;  %819 = vpow2.f32 %v646_v42 }
  0x4e   : > { %v802_v54 = vpop.eup %801  ;;  %821 = vpow2.f32 %v671_v30 }
  0x4f   : > { %243 = vxpose.xlu0.b32.cont [6/11] (short) (narrow) %v792_v41, 64  ;;  %v804_v56 = vpop.eup %803  ;;  %823 = vrcp.f32 %v329_v47  ;;  %v678_v41 = vmul.f32 -1.442695, %v667_v38 }
  0x50   : > { %v806_v59 = vpop.eup %805  ;;  %825 = vpow2.f32 %v647_v50 }
  0x51   : > { %v808_v61 = vpop.eup %807  ;;  %368 = vxpose.xlu1.b32.cont [3/11] (short) (narrow) %v802_v54, 64  ;;  %827 = vpow2.f32 %v672_v52  ;;  %v485_v2 = vadd.f32 %v806_v59, %v1030_v32 }
  0x52   : > { %v810_v62 = vpop.eup %809  ;;  %829 = vpow2.f32 %v648_v55 }
  0x53   : > { %244 = vxpose.xlu0.b32.cont [7/11] (short) (narrow) %v794_v44, 64  ;;  %v812_v1 = vpop.eup %811  ;;  %831 = vrcp.f32 %v330_v58  ;;  %v486_v8 = vmul.f32 32.0, %v485_v2  ;;  %v668_v44 = vld [vmem:[%s1011_s25 + $0x100] sm:$0x1f] }
  0x54   : > { %v814_v3 = vpop.eup %813  ;;  %833 = vpow2.f32 %v649_v60  ;;  %v489_v9 = vmul.f32 373.0, %v812_v1  ;;  %v490_v15 = vmul.f32 326.0, %v812_v1  ;;  %v679_v47 = vmul.f32 -1.442695, %v668_v44 }
  0x55   : > { %v816_v4 = vpop.eup %815  ;;  %369 = vxpose.xlu1.b32.cont [4/11] (short) (narrow) %v810_v62, 64  ;;  %835 = vpow2.f32 %v673_v63  ;;  %v453_v10 = vadd.f32 1.0, %v814_v3 }
  0x56   : > { %v818_v6 = vpop.eup %817  ;;  %837 = vpow2.f32 %v674_v5  ;;  %v491_v18 = vsel %vm232_vm0, %v486_v8, %v489_v9 }
  0x57   : > { %245 = vxpose.xlu0.b32.cont [8/11] (short) (narrow) %v800_v51, 64  ;;  %v820_v7 = vpop.eup %819  ;;  %v492_v26 = vsel %vm234_vm1, %v491_v18, %v490_v15 }
  0x58   : > { %v822_v12 = vpop.eup %821  ;;  %v331_v13 = vadd.f32 1.0, %v820_v7  ;;  %v493_v34 = vsel %vm236_vm2, %v492_v26, %v806_v59 }
  0x59   : > { %v824_v14 = vpop.eup %823  ;;  %370 = vxpose.xlu1.b32.cont [5/11] (short) (narrow) %v818_v6, 64  ;;  %v454_v19 = vadd.f32 1.0, %v822_v12 }
  0x5a   : > { %v826_v32 = vpop.eup %825  ;;  %839 = vrcp.f32 %v331_v13 }
  0x5b   : > { %246 = vxpose.xlu0.b32.cont [9/11] (short) (narrow) %v804_v56, 64  ;;  %v828_v17 = vpop.eup %827  ;;  %841 = vrcp.f32 %v453_v10  ;;  %v332_v21 = vadd.f32 1.0, %v826_v32 }
  0x5c   : > { %v830_v22 = vpop.eup %829  ;;  %v455_v28 = vadd.f32 1.0, %v828_v17 }
  0x5d   : > { %v832_v23 = vpop.eup %831  ;;  %371 = vxpose.xlu1.b32.cont [6/11] (short) (narrow) %v824_v14, 64  ;;  %843 = vrcp.f32 %v332_v21  ;;  %v333_v24 = vadd.f32 1.0, %v830_v22 }
  0x5e   : > { %v834_v25 = vpop.eup %833  ;;  %845 = vpow2.f32 %v675_v16 }
  0x5f   : > { %247 = vxpose.xlu0.b32.cont [10/11] (short) (narrow) %v808_v61, 64  ;;  %847 = vrcp.f32 %v454_v19  ;;  %v836_v31 = vpop.eup %835  ;;  %v334_v33 = vadd.f32 1.0, %v834_v25 }
  0x60   : > { %849 = vrcp.f32 %v333_v24  ;;  %v838_v36 = vpop.eup %837  ;;  %v456_v37 = vadd.f32 1.0, %v836_v31 }
  0x61   : > { %372 = vxpose.xlu1.b32.cont [7/11] (short) (narrow) %v832_v23, 64  ;;  %851 = vpow2.f32 %v676_v27  ;;  %v457_v43 = vadd.f32 1.0, %v838_v36 }
  0x62   : > { %853 = vrcp.f32 %v455_v28 }
  0x63   : > { %248 = vxpose.xlu0.b32.end [11/11] (short) (narrow) %v816_v4, 64  ;;  %855 = vrcp.f32 %v334_v33 }
  0x64   : > { %v840_v39 = vpop.eup %839  ;;  %857 = vpow2.f32 %v677_v35 }
  0x65   : > { %v842_v40 = vpop.eup %841  ;;  %373 = vxpose.xlu1.b32.cont [8/11] (short) (narrow) %v840_v39, 64  ;;  %859 = vrcp.f32 %v456_v37 }
  0x66   : > { %861 = vpow2.f32 %v678_v41 }
  0x67   : > { %494 = vxpose.xlu0.b32.start [1/11] (short) (narrow) %v493_v34, 64  ;;  %v844_v42 = vpop.eup %843  ;;  %863 = vrcp.f32 %v457_v43 }
  0x68   : > { %v846_v30 = vpop.eup %845  ;;  %865 = vpow2.f32 %v679_v47 }
  0x69   : > { %v848_v45 = vpop.eup %847  ;;  %374 = vxpose.xlu1.b32.cont [9/11] (short) (narrow) %v844_v42, 64  ;;  %v458_v48 = vadd.f32 1.0, %v846_v30 }
  0x6a   : > { %v850_v46 = vpop.eup %849 }
  0x6b   : > { %495 = vxpose.xlu0.b32.cont [2/11] (short) (narrow) %v842_v40, 64  ;;  %v852_v49 = vpop.eup %851  ;;  %867 = vrcp.f32 %v458_v48 }
  0x6c   : > { %v854_v50 = vpop.eup %853  ;;  %v459_v52 = vadd.f32 1.0, %v852_v49 }
  0x6d   : > { %375 = vxpose.xlu1.b32.cont [10/11] (short) (narrow) %v850_v46, 64  ;;  %v856_v51 = vpop.eup %855 }
  0x6e   : > { %v858_v53 = vpop.eup %857  ;;  %869 = vrcp.f32 %v459_v52 }
  0x6f   : > { %496 = vxpose.xlu0.b32.cont [3/11] (short) (narrow) %v848_v45, 64  ;;  %v860_v54 = vpop.eup %859  ;;  %v460_v55 = vadd.f32 1.0, %v858_v53 }
  0x70   : > { %v862_v56 = vpop.eup %861 }
  0x71   : > { %376 = vxpose.xlu1.b32.end [11/11] (short) (narrow) %v856_v51, 64  ;;  %v864_v57 = vpop.eup %863  ;;  %871 = vrcp.f32 %v460_v55  ;;  %v461_v58 = vadd.f32 1.0, %v862_v56 }
  0x72   : > { %v866_v59 = vpop.eup %865 }
  0x73   : > { %497 = vxpose.xlu0.b32.cont [4/11] (short) (narrow) %v854_v50, 64  ;;  %873 = vrcp.f32 %v461_v58  ;;  %v462_v61 = vadd.f32 1.0, %v866_v59 }
  0x75   : > { %v868_v60 = vpop.eup %867  ;;  %875 = vrcp.f32 %v462_v61 }
  0x77   : > { %498 = vxpose.xlu0.b32.cont [5/11] (short) (narrow) %v860_v54, 64 }
  0x78   : > { %v870_v62 = vpop.eup %869 }
  0x7b   : > { %499 = vxpose.xlu0.b32.cont [6/11] (short) (narrow) %v864_v57, 64  ;;  %v872_v63 = vpop.eup %871 }
  0x7d   : > { %v874_v0 = vpop.eup %873 }
  0x7f   : > { %500 = vxpose.xlu0.b32.cont [7/11] (short) (narrow) %v868_v60, 64  ;;  %v876_v1 = vpop.eup %875 }
  0x83   : > { %501 = vxpose.xlu0.b32.cont [8/11] (short) (narrow) %v870_v62, 64 }
  0x87   : > { %502 = vxpose.xlu0.b32.cont [9/11] (short) (narrow) %v872_v63, 64 }
  0x8b   : > { %503 = vxpose.xlu0.b32.cont [10/11] (short) (narrow) %v874_v0, 64 }
  0x8f   : > { %504 = vxpose.xlu0.b32.end [11/11] (short) (narrow) %v876_v1, 64 }
  0xbb   : > { %v254_v2 = vpop.trf.xlu0 }
  0xbc   : > { %271 = vst.msk [vmem:[%s1070_s30] sm:$0xff] %vm270_vm3, %v254_v2 }
  0xbf   : > { %v255_v3 = vpop.trf.xlu0 }
  0xc0   : > { %272 = vst.msk [vmem:[%s1070_s30 + $0x8] sm:$0xff] %vm270_vm3, %v255_v3 }
  0xc3   : > { %v256_v4 = vpop.trf.xlu0 }
  0xc4   : > { %273 = vst.msk [vmem:[%s1070_s30 + $0x10] sm:$0xff] %vm270_vm3, %v256_v4 }
  0xc7   : > { %v257_v5 = vpop.trf.xlu0 }
  0xc8   : > { %274 = vst.msk [vmem:[%s1070_s30 + $0x18] sm:$0xff] %vm270_vm3, %v257_v5 }
  0xc9   : > { %v382_v7 = vpop.trf.xlu1 }
  0xca   : > { %650 = vst.msk [vmem:[%s1070_s30 + $0x40] sm:$0xff] %vm270_vm3, %v382_v7 }
  0xcb   : > { %v258_v6 = vpop.trf.xlu0 }
  0xcc   : > { %275 = vst.msk [vmem:[%s1070_s30 + $0x20] sm:$0xff] %vm270_vm3, %v258_v6 }
  0xcd   : > { %v383_v9 = vpop.trf.xlu1 }
  0xce   : > { %651 = vst.msk [vmem:[%s1070_s30 + $0x48] sm:$0xff] %vm270_vm3, %v383_v9 }
  0xcf   : > { %v259_v8 = vpop.trf.xlu0 }
  0xd0   : > { %276 = vst.msk [vmem:[%s1070_s30 + $0x28] sm:$0xff] %vm270_vm3, %v259_v8 }
  0xd1   : > { %v384_v11 = vpop.trf.xlu1 }
  0xd2   : > { %652 = vst.msk [vmem:[%s1070_s30 + $0x50] sm:$0xff] %vm270_vm3, %v384_v11 }
  0xd3   : > { %v260_v10 = vpop.trf.xlu0 }
  0xd4   : > { %277 = vst.msk [vmem:[%s1070_s30 + $0x30] sm:$0xff] %vm270_vm3, %v260_v10 }
  0xd5   : > { %v385_v13 = vpop.trf.xlu1 }
  0xd6   : > { %653 = vst.msk [vmem:[%s1070_s30 + $0x58] sm:$0xff] %vm270_vm3, %v385_v13 }
  0xd7   : > { %v261_v12 = vpop.trf.xlu0 }
  0xd8   : > { %278 = vst.msk [vmem:[%s1070_s30 + $0x38] sm:$0xff] %vm270_vm3, %v261_v12 }
  0xd9   : > { %v386_v14 = vpop.trf.xlu1 }
  0xda   : > { %654 = vst.msk [vmem:[%s1070_s30 + $0x60] sm:$0xff] %vm270_vm3, %v386_v14 }
  0xdd   : > { %v387_v32 = vpop.trf.xlu1 }
  0xde   : > { %655 = vst.msk [vmem:[%s1070_s30 + $0x68] sm:$0xff] %vm270_vm3, %v387_v32 }
  0xe1   : > { %v388_v15 = vpop.trf.xlu1 }
  0xe2   : > { %656 = vst.msk [vmem:[%s1070_s30 + $0x70] sm:$0xff] %vm270_vm3, %v388_v15 }
  0xe5   : > { %v389_v17 = vpop.trf.xlu1 }
  0xe6   : > { %657 = vst.msk [vmem:[%s1070_s30 + $0x78] sm:$0xff] %vm270_vm3, %v389_v17 }
  0xe7   : > { %v510_v16 = vpop.trf.xlu0 }
  0xe8   : > { %680 = vst.msk [vmem:[%s1070_s30 + $0x80] sm:$0xff] %vm270_vm3, %v510_v16 }
  0xeb   : > { %v511_v18 = vpop.trf.xlu0 }
  0xec   : > { %681 = vst.msk [vmem:[%s1070_s30 + $0x88] sm:$0xff] %vm270_vm3, %v511_v18 }
  0xef   : > { %v512_v19 = vpop.trf.xlu0 }
  0xf0   : > { %682 = vst.msk [vmem:[%s1070_s30 + $0x90] sm:$0xff] %vm270_vm3, %v512_v19 }
  0xf3   : > { %v513_v20 = vpop.trf.xlu0 }
  0xf4   : > { %683 = vst.msk [vmem:[%s1070_s30 + $0x98] sm:$0xff] %vm270_vm3, %v513_v20 }
  0xf7   : > { %v514_v21 = vpop.trf.xlu0 }
  0xf8   : > { %684 = vst.msk [vmem:[%s1070_s30 + $0xa0] sm:$0xff] %vm270_vm3, %v514_v21 }
  0xfb   : > { %v515_v22 = vpop.trf.xlu0 }
  0xfc   : > { %685 = vst.msk [vmem:[%s1070_s30 + $0xa8] sm:$0xff] %vm270_vm3, %v515_v22 }
  0xff   : > { %v516_v23 = vpop.trf.xlu0 }
 0x100   : > { %686 = vst.msk [vmem:[%s1070_s30 + $0xb0] sm:$0xff] %vm270_vm3, %v516_v23 }
 0x103   : > { %v517_v24 = vpop.trf.xlu0 }
 0x104   : > { %687 = vst.msk [vmem:[%s1070_s30 + $0xb8] sm:$0xff] %vm270_vm3, %v517_v24 }
 0x105   : > { %890 = shalt.err (!%p887_p3)
}
 0x106   : > { %s891_s21 = scalar_lea.hbm %s1123_s7, 3072  ;;  %s895_s24 = scalar_lea.hbm %s1174_s2, 6144 }
 0x107   : > { %p892_p4 = scmp.ne.s32.totalorder %s1123_s7, %s891_s21  ;;  %p896_p9 = scmp.lt.u32.totalorder %s1123_s7, %s1174_s2 }
 0x108   : > { %p897_p10 = scmp.lt.u32.totalorder %s895_s24, %s891_s21  ;;  %p899_p12 = scmp.lt.u32.totalorder %s891_s21, %s1123_s7 }
 0x109   : > { %p893_p7 = pnand %p892_p4, %p997_p5 }
 0x10a   : > { %p898_p11 = por %p897_p10, %p896_p9 }
 0x10b   : > { %p894_p8 = pneg %p893_p7 }
 0x10c   : > { %p900_p13 = por %p899_p12, %p898_p11 }
 0x10e   : > { %p901_p0 = pnand %p900_p13, %p894_p8 }
 0x110   : > { %904 = shalt.err (!%p901_p0)
}
 0x111   : > { %s942_s27 = smov 128   ;;  %s943_s28 = smov 8  }
 0x112   : > { %697 = dma.vmem_to_hbm [thread:$0]  (%p997_p5), %s1125_s4, 3072, %s1123_s7, %s1131_s8, %s942_s27, %s942_s27, %s943_s28  }
 0x113 PF: > { %p703_p1 = scmp.ge.s32.totalorder %s939_s12, 2  ;;  %s565_s29 = sand.u32 1, %s927_s9  }
 0x114   : > { %s566_s30 = scalar_lea.sflag [#allocation3], %s565_s29 }
 0x115   : > { %p700_p2 = pnand %p703_p1, %p1001_p6 }
 0x117   : > { %922 = dma.done.wait (!%p700_p2), %s566_s30, 3072  }
 0x118   : > { %924 = vsyncadd (!%p700_p2), %s566_s30, 4294964224  ;;  %p12_p3 = scmp.ge.s32.totalorder %s984_s15, 4   ;;  %s1177_s9 = smov %s931_s10 }
 0x119   : > { %s1178_s10 = smov %s935_s11  ;;  %s1179_s11 = smov %s995_s18 }
 0x11a   : > { %s1180_s12 = smov %s984_s15  ;;  %14 = sbr.rel (!%p12_p3) target bundleno = 3 (0x3), region = 67 }
 0x121   :  { %571 = vsyncpa [#allocation3], 1 }
 0x122   :  { %573 = vsyncpa [#allocation3 + $0x1], 1 }

</bundles_post_ra>
